<compile_context>
chip_gen: v5e
topology: v5e:2x2
jax: 0.10.0
libtpu: 0.0.40
codegen_flags: <defaults>
</compile_context>

<pallas_src>
import jax
import jax.numpy as jnp
from jax.experimental import pallas as pl
from jax.experimental.pallas import tpu as pltpu

LANES = 128          # lane width of the fused pipeline
NUM_STAGES = 9       # 8 fused Linear+BN+ReLU stages + 1 final Linear (no ReLU)

# rough per-row MXU cost vs per-grid-step overhead (cycles-ish), used only to pick a tile
_ROW_COST = 20
_STEP_COST = 1000
_TB_CANDIDATES = (8, 16, 32, 64, 128, 256, 512, 1024)


def _round_up(v, m):
    return -(-v // m) * m


def _choose_tile(b8):
    """Pick a batch tile minimizing padded-row waste + grid-step overhead.

    For b8 >= 64 we force >= 2 grid steps so a v7x chip can use both TensorCores.
    """
    best = None
    for tb in _TB_CANDIDATES:
        bp = _round_up(b8, tb)
        steps = bp // tb
        if b8 >= 64 and steps < 2:
            continue
        cost = bp * _ROW_COST + steps * _STEP_COST
        if best is None or cost < best[0]:
            best = (cost, tb, bp)
    _, tb, bp = best
    return tb, bp


def _make_kernel(k_list, offsets, n_chains, rows_per_chain):
    """Whole network as 9 lane-dense MXU matmul stages, interleaved over row chains.

    x_ref  : (TB, K0)        bf16  zero-padded input (real features in lanes [0:input_size])
    w_ref  : (K_total, 128)  bf16  ragged-K packed / folded / zero-padded weight slab
    c_ref  : (9, 1, 128)     f32   folded bias (Linear bias * BN scale + BN shift)
    out_ref: (TB, 128)       bf16  lane-dense output (real logits in lanes [0:output_size])
    """
    def kernel(x_ref, w_ref, c_ref, out_ref):
        # split the batch tile into independent dependence chains (row halves)
        hs = [x_ref[pl.ds(ci * rows_per_chain, rows_per_chain), :]
              for ci in range(n_chains)]
        for s in range(NUM_STAGES):
            k, off = k_list[s], offsets[s]
            w = w_ref[pl.ds(off, k), :]          # static, 16-sublane-aligned slice
            c = c_ref[s]
            nxt = []
            for h in hs:                         # stage-major: chains interleave on the MXU
                hk = h if h.shape[1] == k else h[:, :k]
                y = jnp.dot(hk.astype(jnp.bfloat16), w,
                            preferred_element_type=jnp.float32) + c
                nxt.append(jnp.maximum(y, 0.0) if s < NUM_STAGES - 1 else y)
            hs = nxt
        for ci in range(n_chains):
            out_ref[pl.ds(ci * rows_per_chain, rows_per_chain), :] = \
                hs[ci].astype(out_ref.dtype)
    return kernel


def joint_imu_mlp_forward(x, packed, output_size):
    """Glue: reshape+cast+pad to a bf16 (BP,K0) tile, run fused kernel, slice back."""
    w_slab = packed["w_slab"]            # (K_total, 128) bf16
    c_slab = packed["c_slab"]            # (9, 1, 128)    f32
    k_list = packed["k_list"]            # python ints (static)
    offsets = packed["offsets"]
    k_total = packed["k_total"]
    k0 = packed["k0"]

    b = x.shape[0]
    xf = x.reshape(b, -1)
    f = xf.shape[1]
    assert f <= k0, "input features exceed packed stage-0 width"

    tb, bp = _choose_tile(_round_up(b, 8))

    # one fused reshape+cast+pad pass; skipped entirely when already aligned
    xb = xf.astype(jnp.bfloat16)
    if (bp, k0) != (b, f):
        xb = jnp.pad(xb, ((0, bp - b), (0, k0 - f)))

    n_chains = 2 if tb >= 32 else 1      # rows_per_chain stays a multiple of 16 (bf16 tiles)
    rpc = tb // n_chains
    kernel = _make_kernel(k_list, offsets, n_chains, rpc)

    out = pl.pallas_call(
        kernel,
        out_shape=jax.ShapeDtypeStruct((bp, LANES), jnp.bfloat16),
        grid_spec=pltpu.PrefetchScalarGridSpec(
            num_scalar_prefetch=0,
            grid=(bp // tb,),
            in_specs=[
                pl.BlockSpec((tb, k0), lambda i: (i, 0)),
                pl.BlockSpec((k_total, LANES), lambda i: (0, 0)),        # resident weights
                pl.BlockSpec((NUM_STAGES, 1, LANES), lambda i: (0, 0, 0)),  # resident biases
            ],
            out_specs=pl.BlockSpec((tb, LANES), lambda i: (i, 0)),
        ),
        compiler_params=pltpu.CompilerParams(dimension_semantics=("parallel",)),
    )(xb, w_slab, c_slab)

    return out[:b, :output_size].astype(jnp.float32)


def init_params(key, input_size, hidden_size, output_size):
    """Deterministic synthetic parameters (the pretrained pid checkpoint is not loadable here).

    Per layer: Linear weight (in,out), bias (1,out), and eval-mode BatchNorm1d folded to
        scale = gamma / sqrt(running_var + eps),  shift = beta - running_mean * scale
    """
    h = hidden_size
    h4, h16 = h // 4, h // 16
    cat = h4 + h16
    eps = 1e-5

    dims = [
        (input_size, h), (h, h4), (h4, h4), (h4, h16),   # pid: MLP0 + MLP2 (layers[3] -> Identity)
        (input_size, h), (h, h4),                        # action_features: MLP
        (cat, h), (h, h4), (h4, h4), (h4, h16),          # action: MLP0 + MLP2
    ]

    bn_layers = []
    for (fi, fo) in dims:
        key, kw, kb, kg, kbe, km, kv = jax.random.split(key, 7)
        bound = float(fi) ** -0.5
        w = jax.random.uniform(kw, (fi, fo), jnp.float32, -bound, bound)
        b = jax.random.uniform(kb, (1, fo), jnp.float32, -bound, bound)
        gamma = jax.random.uniform(kg, (1, fo), jnp.float32, 0.8, 1.2)
        beta = jax.random.uniform(kbe, (1, fo), jnp.float32, -0.1, 0.1)
        rmean = jax.random.uniform(km, (1, fo), jnp.float32, -0.1, 0.1)
        rvar = jax.random.uniform(kv, (1, fo), jnp.float32, 0.5, 1.5)
        scale = gamma / jnp.sqrt(rvar + eps)
        shift = beta - rmean * scale
        bn_layers.append((w, b, scale, shift))

    key, kw, kb = jax.random.split(key, 3)
    bound = float(h16) ** -0.5
    final_w = jax.random.uniform(kw, (h16, output_size), jnp.float32, -bound, bound)
    final_b = jax.random.uniform(kb, (1, output_size), jnp.float32, -bound, bound)
    return {"bn_layers": bn_layers, "final_w": final_w, "final_b": final_b}


def pack_params(params, input_size, hidden_size, output_size):
    """Fold BN into the Linears, merge branches, pack into a ragged-K flat weight slab."""
    h = hidden_size
    h4, h16 = h // 4, h // 16
    cat = h4 + h16
    assert input_size <= LANES and 2 * h <= LANES and cat <= LANES and output_size <= LANES, \
        "128-lane fused pipeline requires input_size<=128, 2*hidden<=128, output<=128"
    assert h % 16 == 0, "hidden_size must be a multiple of 16"

    fw, fc = [], []
    for (w, b, sc, sh) in params["bn_layers"]:
        fw.append(w * sc)            # W' = W * scale   (scale acts on out-features)
        fc.append(b * sc + sh)       # c  = b * scale + shift

    eye4 = jnp.eye(h4, dtype=jnp.float32)

    # per-stage (active K, weight sub-blocks placed at (row, col)) — ragged K layout
    stage_w = [
        (input_size, [(0, 0, fw[0]), (0, h, fw[4])]),        # x -> [pid_h0 | af_h0]
        (2 * h,      [(0, 0, fw[1]), (h, h4, fw[5])]),        # -> [pid_h1 | action_features]
        (2 * h4,     [(0, 0, fw[2]), (h4, h4, eye4)]),        # pid MLP2-L0, carry af (af>=0!)
        (2 * h4,     [(0, 0, fw[3]), (h4, h16, eye4)]),       # pid MLP2-L1 -> cat=[pid_out|af]
        (cat,        [(0, 0, fw[6])]),                        # action MLP0-L0
        (h,          [(0, 0, fw[7])]),                        # action MLP0-L1
        (h4,         [(0, 0, fw[8])]),                        # action MLP2-L0
        (h4,         [(0, 0, fw[9])]),                        # action MLP2-L1
        (h16,        [(0, 0, params["final_w"])]),            # action final Linear (no ReLU)
    ]
    stage_c = [
        [(0, fc[0]), (h, fc[4])],
        [(0, fc[1]), (h4, fc[5])],
        [(0, fc[2])],
        [(0, fc[3])],
        [(0, fc[6])],
        [(0, fc[7])],
        [(0, fc[8])],
        [(0, fc[9])],
        [(0, params["final_b"])],
    ]

    k_list, offsets, rows = [], [], []
    off = 0
    for (k_act, entries) in stage_w:
        k = max(32, _round_up(k_act, 32))      # 32-aligned offsets -> bf16 tile-aligned slices
        m = jnp.zeros((k, LANES), jnp.float32)
        for (r0, c0, sub) in entries:
            m = m.at[r0:r0 + sub.shape[0], c0:c0 + sub.shape[1]].set(sub)
        rows.append(m)
        k_list.append(k)
        offsets.append(off)
        off += k

    cs = []
    for entries in stage_c:
        v = jnp.zeros((1, LANES), jnp.float32)
        for (c0, sub) in entries:
            v = v.at[:, c0:c0 + sub.shape[1]].set(sub)
        cs.append(v)

    return {
        "w_slab": jnp.concatenate(rows, axis=0).astype(jnp.bfloat16),   # (K_total, 128) bf16
        "c_slab": jnp.stack(cs),                                        # (9, 1, 128)  f32
        "k_list": tuple(k_list),
        "offsets": tuple(offsets),
        "k_total": off,
        "k0": k_list[0],
    }


def reference_forward_packed(x, packed, output_size):
    """Pure-JAX twin of the kernel math (same folding, ragged K, bf16 casts)."""
    w, c = packed["w_slab"], packed["c_slab"]
    k_list, offsets, k0 = packed["k_list"], packed["offsets"], packed["k0"]
    b = x.shape[0]
    xf = x.reshape(b, -1)
    h = jnp.zeros((b, k0), jnp.bfloat16).at[:, :xf.shape[1]].set(xf.astype(jnp.bfloat16))
    for s in range(NUM_STAGES):
        k, off = k_list[s], offsets[s]
        y = jnp.dot(h[:, :k].astype(jnp.bfloat16), w[off:off + k],
                    preferred_element_type=jnp.float32) + c[s]
        h = jnp.maximum(y, 0.0) if s < NUM_STAGES - 1 else y
    return h.astype(jnp.bfloat16)[:, :output_size].astype(jnp.float32)


def reference_forward(x, params):
    """Pure-JAX f32 reference of the original (eval-mode) forward pass, no folding."""
    x = x.reshape(x.shape[0], -1).astype(jnp.float32)

    def layer(h, p):
        w, b, sc, sh = p
        return jnp.maximum((h @ w + b) * sc + sh, 0.0)

    bl = params["bn_layers"]
    h = layer(x, bl[0]); h = layer(h, bl[1]); h = layer(h, bl[2]); pid = layer(h, bl[3])
    a = layer(x, bl[4]); af = layer(a, bl[5])
    c = jnp.concatenate([pid, af], axis=1)
    h = layer(c, bl[6]); h = layer(h, bl[7]); h = layer(h, bl[8]); h = layer(h, bl[9])
    return h @ params["final_w"] + params["final_b"]


if __name__ == "__main__":
    # joint_IMU_MLP(input_size=32, hidden_size=64, output_size=10)
    INPUT_SIZE, HIDDEN, OUTPUT = 32, 64, 10

    key = jax.random.PRNGKey(0)
    key, kp = jax.random.split(key)

    # TODO(synk): the real module torch.load()s a pretrained pid checkpoint; synthetic params here.
    # TODO(synk): training-mode Dropout randomness / batch-stat BatchNorm not implemented (eval mode).
    params = init_params(kp, INPUT_SIZE, HIDDEN, OUTPUT)
    packed = pack_params(params, INPUT_SIZE, HIDDEN, OUTPUT)

    # batch 8  -> single tile / single chain path
    # batch 200 -> 2 grid steps (dual-TC path), 2 interleaved chains, batch padding sliced off
    for batch in (8, 200):
        key, kx = jax.random.split(key)
        x = jax.random.normal(kx, (batch, INPUT_SIZE), dtype=jnp.float32)

        out = jax.block_until_ready(joint_imu_mlp_forward(x, packed, OUTPUT))
        assert out.shape == (batch, OUTPUT)

        # exact-math twin (same bf16 casts / folding / ragged K) -> tight tolerance
        ref_packed = reference_forward_packed(x, packed, OUTPUT)
        assert jnp.allclose(out, ref_packed, atol=1e-2, rtol=1e-2), \
            f"kernel mismatch vs packed reference (batch={batch})"

        # unfolded f32 reference of the original module -> tolerance covers bf16 MXU/output
        ref_f32 = reference_forward(x, params)
        assert jnp.allclose(out, ref_f32, atol=1.5e-1, rtol=1e-1), \
            f"kernel mismatch vs f32 reference (batch={batch})"

    print("KERNEL_OK")
</pallas_src>

<mosaic_0001>
module attributes {stable_mosaic.version = 11 : i64} {
  func.func @kernel(%arg0: i32, %arg1: memref<8x32xbf16, #tpu.memory_space<vmem>>, %arg2: memref<416x128xbf16, #tpu.memory_space<vmem>>, %arg3: memref<9x1x128xf32, #tpu.memory_space<vmem>>, %arg4: memref<8x128xbf16, #tpu.memory_space<vmem>>) attributes {dimension_semantics = [#tpu.dimension_semantics<parallel>], iteration_bounds = array<i64: 1>, scalar_prefetch = 0 : i64, scratch_operands = 0 : i64, tpu.core_type = #tpu.core_type<tc>, window_params = [{transform_indices = @transform_0, window_bounds = array<i64: 8, 32>}, {pipeline_mode = #tpu.pipeline_mode<synchronous>, transform_indices = @transform_1, window_bounds = array<i64: 416, 128>}, {pipeline_mode = #tpu.pipeline_mode<synchronous>, transform_indices = @transform_2, window_bounds = array<i64: 9, 1, 128>}, {transform_indices = @transform_3, window_bounds = array<i64: 8, 128>}]} {
    %c0 = arith.constant 0 : index
    %c0_0 = arith.constant 0 : index
    %0 = vector.load %arg1[%c0, %c0_0] : memref<8x32xbf16, #tpu.memory_space<vmem>>, vector<8x32xbf16>
    %c0_1 = arith.constant 0 : index
    %c0_2 = arith.constant 0 : index
    %1 = vector.load %arg2[%c0_1, %c0_2] : memref<416x128xbf16, #tpu.memory_space<vmem>>, vector<32x128xbf16>
    %c0_3 = arith.constant 0 : index
    %c0_4 = arith.constant 0 : index
    %c0_5 = arith.constant 0 : index
    %2 = vector.load %arg3[%c0_3, %c0_4, %c0_5] : memref<9x1x128xf32, #tpu.memory_space<vmem>>, vector<1x1x128xf32>
    %3 = vector.shape_cast %2 : vector<1x1x128xf32> to vector<1x128xf32>
    %cst = arith.constant dense<0.000000e+00> : vector<8x128xf32>
    %4 = tpu.matmul %0, %1, %cst {dimension_numbers = #tpu.dot_dimension_numbers<[1], [0], [0], [1], [0, 0, 1, 1], [], []>} : vector<8x32xbf16>, vector<32x128xbf16>, vector<8x128xf32> -> vector<8x128xf32>
    %5 = vector.broadcast %3 : vector<1x128xf32> to vector<8x128xf32>
    %6 = arith.addf %4, %5 : vector<8x128xf32>
    %cst_6 = arith.constant 0.000000e+00 : f32
    %7 = vector.broadcast %cst_6 : f32 to vector<8x128xf32>
    %8 = arith.maximumf %6, %7 : vector<8x128xf32>
    %c32 = arith.constant 32 : index
    %c0_7 = arith.constant 0 : index
    %9 = vector.load %arg2[%c32, %c0_7] : memref<416x128xbf16, #tpu.memory_space<vmem>>, vector<128x128xbf16>
    %c1 = arith.constant 1 : index
    %c0_8 = arith.constant 0 : index
    %c0_9 = arith.constant 0 : index
    %10 = vector.load %arg3[%c1, %c0_8, %c0_9] : memref<9x1x128xf32, #tpu.memory_space<vmem>>, vector<1x1x128xf32>
    %11 = vector.shape_cast %10 : vector<1x1x128xf32> to vector<1x128xf32>
    %12 = arith.truncf %8 : vector<8x128xf32> to vector<8x128xbf16>
    %cst_10 = arith.constant dense<0.000000e+00> : vector<8x128xf32>
    %13 = tpu.matmul %12, %9, %cst_10 {dimension_numbers = #tpu.dot_dimension_numbers<[1], [0], [0], [1], [0, 0, 1, 1], [], []>} : vector<8x128xbf16>, vector<128x128xbf16>, vector<8x128xf32> -> vector<8x128xf32>
    %14 = vector.broadcast %11 : vector<1x128xf32> to vector<8x128xf32>
    %15 = arith.addf %13, %14 : vector<8x128xf32>
    %cst_11 = arith.constant 0.000000e+00 : f32
    %16 = vector.broadcast %cst_11 : f32 to vector<8x128xf32>
    %17 = arith.maximumf %15, %16 : vector<8x128xf32>
    %c160 = arith.constant 160 : index
    %c0_12 = arith.constant 0 : index
    %18 = vector.load %arg2[%c160, %c0_12] : memref<416x128xbf16, #tpu.memory_space<vmem>>, vector<32x128xbf16>
    %c2 = arith.constant 2 : index
    %c0_13 = arith.constant 0 : index
    %c0_14 = arith.constant 0 : index
    %19 = vector.load %arg3[%c2, %c0_13, %c0_14] : memref<9x1x128xf32, #tpu.memory_space<vmem>>, vector<1x1x128xf32>
    %20 = vector.shape_cast %19 : vector<1x1x128xf32> to vector<1x128xf32>
    %21 = vector.extract_strided_slice %17 {offsets = [0, 0], sizes = [8, 32], strides = [1, 1]} : vector<8x128xf32> to vector<8x32xf32>
    %22 = arith.truncf %21 : vector<8x32xf32> to vector<8x32xbf16>
    %cst_15 = arith.constant dense<0.000000e+00> : vector<8x128xf32>
    %23 = tpu.matmul %22, %18, %cst_15 {dimension_numbers = #tpu.dot_dimension_numbers<[1], [0], [0], [1], [0, 0, 1, 1], [], []>} : vector<8x32xbf16>, vector<32x128xbf16>, vector<8x128xf32> -> vector<8x128xf32>
    %24 = vector.broadcast %20 : vector<1x128xf32> to vector<8x128xf32>
    %25 = arith.addf %23, %24 : vector<8x128xf32>
    %cst_16 = arith.constant 0.000000e+00 : f32
    %26 = vector.broadcast %cst_16 : f32 to vector<8x128xf32>
    %27 = arith.maximumf %25, %26 : vector<8x128xf32>
    %c192 = arith.constant 192 : index
    %c0_17 = arith.constant 0 : index
    %28 = vector.load %arg2[%c192, %c0_17] : memref<416x128xbf16, #tpu.memory_space<vmem>>, vector<32x128xbf16>
    %c3 = arith.constant 3 : index
    %c0_18 = arith.constant 0 : index
    %c0_19 = arith.constant 0 : index
    %29 = vector.load %arg3[%c3, %c0_18, %c0_19] : memref<9x1x128xf32, #tpu.memory_space<vmem>>, vector<1x1x128xf32>
    %30 = vector.shape_cast %29 : vector<1x1x128xf32> to vector<1x128xf32>
    %31 = vector.extract_strided_slice %27 {offsets = [0, 0], sizes = [8, 32], strides = [1, 1]} : vector<8x128xf32> to vector<8x32xf32>
    %32 = arith.truncf %31 : vector<8x32xf32> to vector<8x32xbf16>
    %cst_20 = arith.constant dense<0.000000e+00> : vector<8x128xf32>
    %33 = tpu.matmul %32, %28, %cst_20 {dimension_numbers = #tpu.dot_dimension_numbers<[1], [0], [0], [1], [0, 0, 1, 1], [], []>} : vector<8x32xbf16>, vector<32x128xbf16>, vector<8x128xf32> -> vector<8x128xf32>
    %34 = vector.broadcast %30 : vector<1x128xf32> to vector<8x128xf32>
    %35 = arith.addf %33, %34 : vector<8x128xf32>
    %cst_21 = arith.constant 0.000000e+00 : f32
    %36 = vector.broadcast %cst_21 : f32 to vector<8x128xf32>
    %37 = arith.maximumf %35, %36 : vector<8x128xf32>
    %c224 = arith.constant 224 : index
    %c0_22 = arith.constant 0 : index
    %38 = vector.load %arg2[%c224, %c0_22] : memref<416x128xbf16, #tpu.memory_space<vmem>>, vector<32x128xbf16>
    %c4 = arith.constant 4 : index
    %c0_23 = arith.constant 0 : index
    %c0_24 = arith.constant 0 : index
    %39 = vector.load %arg3[%c4, %c0_23, %c0_24] : memref<9x1x128xf32, #tpu.memory_space<vmem>>, vector<1x1x128xf32>
    %40 = vector.shape_cast %39 : vector<1x1x128xf32> to vector<1x128xf32>
    %41 = vector.extract_strided_slice %37 {offsets = [0, 0], sizes = [8, 32], strides = [1, 1]} : vector<8x128xf32> to vector<8x32xf32>
    %42 = arith.truncf %41 : vector<8x32xf32> to vector<8x32xbf16>
    %cst_25 = arith.constant dense<0.000000e+00> : vector<8x128xf32>
    %43 = tpu.matmul %42, %38, %cst_25 {dimension_numbers = #tpu.dot_dimension_numbers<[1], [0], [0], [1], [0, 0, 1, 1], [], []>} : vector<8x32xbf16>, vector<32x128xbf16>, vector<8x128xf32> -> vector<8x128xf32>
    %44 = vector.broadcast %40 : vector<1x128xf32> to vector<8x128xf32>
    %45 = arith.addf %43, %44 : vector<8x128xf32>
    %cst_26 = arith.constant 0.000000e+00 : f32
    %46 = vector.broadcast %cst_26 : f32 to vector<8x128xf32>
    %47 = arith.maximumf %45, %46 : vector<8x128xf32>
    %c256 = arith.constant 256 : index
    %c0_27 = arith.constant 0 : index
    %48 = vector.load %arg2[%c256, %c0_27] : memref<416x128xbf16, #tpu.memory_space<vmem>>, vector<64x128xbf16>
    %c5 = arith.constant 5 : index
    %c0_28 = arith.constant 0 : index
    %c0_29 = arith.constant 0 : index
    %49 = vector.load %arg3[%c5, %c0_28, %c0_29] : memref<9x1x128xf32, #tpu.memory_space<vmem>>, vector<1x1x128xf32>
    %50 = vector.shape_cast %49 : vector<1x1x128xf32> to vector<1x128xf32>
    %51 = vector.extract_strided_slice %47 {offsets = [0, 0], sizes = [8, 64], strides = [1, 1]} : vector<8x128xf32> to vector<8x64xf32>
    %52 = arith.truncf %51 : vector<8x64xf32> to vector<8x64xbf16>
    %cst_30 = arith.constant dense<0.000000e+00> : vector<8x128xf32>
    %53 = tpu.matmul %52, %48, %cst_30 {dimension_numbers = #tpu.dot_dimension_numbers<[1], [0], [0], [1], [0, 0, 1, 1], [], []>} : vector<8x64xbf16>, vector<64x128xbf16>, vector<8x128xf32> -> vector<8x128xf32>
    %54 = vector.broadcast %50 : vector<1x128xf32> to vector<8x128xf32>
    %55 = arith.addf %53, %54 : vector<8x128xf32>
    %cst_31 = arith.constant 0.000000e+00 : f32
    %56 = vector.broadcast %cst_31 : f32 to vector<8x128xf32>
    %57 = arith.maximumf %55, %56 : vector<8x128xf32>
    %c320 = arith.constant 320 : index
    %c0_32 = arith.constant 0 : index
    %58 = vector.load %arg2[%c320, %c0_32] : memref<416x128xbf16, #tpu.memory_space<vmem>>, vector<32x128xbf16>
    %c6 = arith.constant 6 : index
    %c0_33 = arith.constant 0 : index
    %c0_34 = arith.constant 0 : index
    %59 = vector.load %arg3[%c6, %c0_33, %c0_34] : memref<9x1x128xf32, #tpu.memory_space<vmem>>, vector<1x1x128xf32>
    %60 = vector.shape_cast %59 : vector<1x1x128xf32> to vector<1x128xf32>
    %61 = vector.extract_strided_slice %57 {offsets = [0, 0], sizes = [8, 32], strides = [1, 1]} : vector<8x128xf32> to vector<8x32xf32>
    %62 = arith.truncf %61 : vector<8x32xf32> to vector<8x32xbf16>
    %cst_35 = arith.constant dense<0.000000e+00> : vector<8x128xf32>
    %63 = tpu.matmul %62, %58, %cst_35 {dimension_numbers = #tpu.dot_dimension_numbers<[1], [0], [0], [1], [0, 0, 1, 1], [], []>} : vector<8x32xbf16>, vector<32x128xbf16>, vector<8x128xf32> -> vector<8x128xf32>
    %64 = vector.broadcast %60 : vector<1x128xf32> to vector<8x128xf32>
    %65 = arith.addf %63, %64 : vector<8x128xf32>
    %cst_36 = arith.constant 0.000000e+00 : f32
    %66 = vector.broadcast %cst_36 : f32 to vector<8x128xf32>
    %67 = arith.maximumf %65, %66 : vector<8x128xf32>
    %c352 = arith.constant 352 : index
    %c0_37 = arith.constant 0 : index
    %68 = vector.load %arg2[%c352, %c0_37] : memref<416x128xbf16, #tpu.memory_space<vmem>>, vector<32x128xbf16>
    %c7 = arith.constant 7 : index
    %c0_38 = arith.constant 0 : index
    %c0_39 = arith.constant 0 : index
    %69 = vector.load %arg3[%c7, %c0_38, %c0_39] : memref<9x1x128xf32, #tpu.memory_space<vmem>>, vector<1x1x128xf32>
    %70 = vector.shape_cast %69 : vector<1x1x128xf32> to vector<1x128xf32>
    %71 = vector.extract_strided_slice %67 {offsets = [0, 0], sizes = [8, 32], strides = [1, 1]} : vector<8x128xf32> to vector<8x32xf32>
    %72 = arith.truncf %71 : vector<8x32xf32> to vector<8x32xbf16>
    %cst_40 = arith.constant dense<0.000000e+00> : vector<8x128xf32>
    %73 = tpu.matmul %72, %68, %cst_40 {dimension_numbers = #tpu.dot_dimension_numbers<[1], [0], [0], [1], [0, 0, 1, 1], [], []>} : vector<8x32xbf16>, vector<32x128xbf16>, vector<8x128xf32> -> vector<8x128xf32>
    %74 = vector.broadcast %70 : vector<1x128xf32> to vector<8x128xf32>
    %75 = arith.addf %73, %74 : vector<8x128xf32>
    %cst_41 = arith.constant 0.000000e+00 : f32
    %76 = vector.broadcast %cst_41 : f32 to vector<8x128xf32>
    %77 = arith.maximumf %75, %76 : vector<8x128xf32>
    %c384 = arith.constant 384 : index
    %c0_42 = arith.constant 0 : index
    %78 = vector.load %arg2[%c384, %c0_42] : memref<416x128xbf16, #tpu.memory_space<vmem>>, vector<32x128xbf16>
    %c8 = arith.constant 8 : index
    %c0_43 = arith.constant 0 : index
    %c0_44 = arith.constant 0 : index
    %79 = vector.load %arg3[%c8, %c0_43, %c0_44] : memref<9x1x128xf32, #tpu.memory_space<vmem>>, vector<1x1x128xf32>
    %80 = vector.shape_cast %79 : vector<1x1x128xf32> to vector<1x128xf32>
    %81 = vector.extract_strided_slice %77 {offsets = [0, 0], sizes = [8, 32], strides = [1, 1]} : vector<8x128xf32> to vector<8x32xf32>
    %82 = arith.truncf %81 : vector<8x32xf32> to vector<8x32xbf16>
    %cst_45 = arith.constant dense<0.000000e+00> : vector<8x128xf32>
    %83 = tpu.matmul %82, %78, %cst_45 {dimension_numbers = #tpu.dot_dimension_numbers<[1], [0], [0], [1], [0, 0, 1, 1], [], []>} : vector<8x32xbf16>, vector<32x128xbf16>, vector<8x128xf32> -> vector<8x128xf32>
    %84 = vector.broadcast %80 : vector<1x128xf32> to vector<8x128xf32>
    %85 = arith.addf %83, %84 : vector<8x128xf32>
    %86 = arith.truncf %85 : vector<8x128xf32> to vector<8x128xbf16>
    %c0_46 = arith.constant 0 : index
    %c0_47 = arith.constant 0 : index
    %87 = vector.load %arg4[%c0_46, %c0_47] : memref<8x128xbf16, #tpu.memory_space<vmem>>, vector<8x128xbf16>
    tpu.vector_store %arg4[%c0_46, %c0_47], %86 {strides = array<i32>} : memref<8x128xbf16, #tpu.memory_space<vmem>>, vector<8x128xbf16>,
    return
  }
  func.func @transform_0(%arg0: i32) -> (i32, i32) {
    %c0_i32 = arith.constant 0 : i32
    %c0_i32_0 = arith.constant 0 : i32
    return %arg0, %c0_i32 : i32, i32
  }
  func.func @transform_1(%arg0: i32) -> (i32, i32) {
    %c0_i32 = arith.constant 0 : i32
    %c0_i32_0 = arith.constant 0 : i32
    %c0_i32_1 = arith.constant 0 : i32
    return %c0_i32, %c0_i32_0 : i32, i32
  }
  func.func @transform_2(%arg0: i32) -> (i32, i32, i32) {
    %c0_i32 = arith.constant 0 : i32
    %c0_i32_0 = arith.constant 0 : i32
    %c0_i32_1 = arith.constant 0 : i32
    %c0_i32_2 = arith.constant 0 : i32
    return %c0_i32, %c0_i32_0, %c0_i32_1 : i32, i32, i32
  }
  func.func @transform_3(%arg0: i32) -> (i32, i32) {
    %c0_i32 = arith.constant 0 : i32
    %c0_i32_0 = arith.constant 0 : i32
    return %arg0, %c0_i32 : i32, i32
  }
}

</mosaic_0001>

<bundles_post_ra>
// kernel: tpu_custom_call.1
= control target key start
LH: loop header
LB: loop body
LE: loop exit
PB: predicated region body
PF: predicated region fallthrough
CT: control target
= control target key end

     0   :  { %8 = vsyncpa [#allocation3], 0  ;;  %s797_s0 = inlined_call_operand.hbm [shape: bf16[8,32], index: 0, kind: input, shape index: {}]   ;;  %s798_s1 = inlined_call_operand.hbm [shape: bf16[416,128], index: 1, kind: input, shape index: {}]   ;;  %s799_s2 = inlined_call_operand.hbm [shape: f32[9,1,128], index: 2, kind: input, shape index: {}]   ;;  %s800_s3 = inlined_call_operand.hbm [shape: bf16[8,128], index: 3, kind: output, shape index: {}]  }
   0x1   :  { %9 = vsyncpa [#allocation6], 0  ;;  %s26_s14 = sshll.u32 %s798_s1, 4  ;;  %s27_s14 = int_to_ptr.hbm [resolvable:$true] %s26_s14 }
   0x2   :  { %10 = vsyncpa [#allocation4], 0  ;;  %s750_s15 = smov [#allocation5]   ;;  %s16_s19 = sshll.u32 %s797_s0, 4  ;;  %s17_s19 = int_to_ptr.hbm [resolvable:$true] %s16_s19 }
   0x3   :  { %s28_s16 = sshll.u32 %s750_s15, 4  ;;  %s751_s20 = smov 64   ;;  %s29_s16 = int_to_ptr.vmem [resolvable:$true] %s28_s16 }
   0x4   :  { %s752_s21 = smov 4   ;;  %s753_s22 = smov [#allocation2]  }
   0x5   :  { %34 = dma.hbm_to_vmem [thread:$0]  %s27_s14, 3328, %s29_s16, [#allocation6], %s751_s20, %s751_s20, %s752_s21  }
   0x6   :  { %s18_s23 = sshll.u32 %s753_s22, 4  ;;  %s39_s26 = sshll.u32 %s799_s2, 4  ;;  %s19_s23 = int_to_ptr.vmem [resolvable:$true] %s18_s23  ;;  %s40_s26 = int_to_ptr.hbm [resolvable:$true] %s39_s26 }
   0x7   :  { %21 = dma.hbm_to_vmem [thread:$0]  %s17_s19, 64, %s19_s23, [#allocation3]  }
   0x8   :  { %s754_s1 = smov [#allocation7]   ;;  %s755_s28 = smov 16  }
   0x9   :  { %s41_s27 = sshll.u32 %s754_s1, 4  ;;  %s756_s29 = smov 1   ;;  %s42_s27 = int_to_ptr.vmem [resolvable:$true] %s41_s27 }
   0xa   :  { %47 = dma.hbm_to_vmem [thread:$0]  %s40_s26, 144, %s42_s27, [#allocation6], %s755_s28, %s755_s28, %s756_s29  }
   0xb   :  { %744 = dma.done.wait [#allocation3], 64  }
   0xc   :  { %745 = vsyncadd [#allocation3], 4294967232 }
   0xd   :  { %746 = dma.done.wait [#allocation6], 3472  }
   0xe   :  { %747 = vsyncadd [#allocation6], 4294963824  ;;  %v606_v0 = vld [vmem:[#allocation5 + $0x8] sm:$0xff]  ;;  %v605_v2 = vld [vmem:[#allocation5] sm:$0xff]  ;;  %vm82_vm0 = vcmask 261120   ;;  %vm339_vm1 = vcmask 523264  }
   0xf   :  { %v614_v1 = vld [vmem:[#allocation5 + $0x48] sm:$0xff]  ;;  %92 = vmatpush.bf16.msra.mxu0 %v606_v0  ;;  %v613_v3 = vld [vmem:[#allocation5 + $0x40] sm:$0xff]  ;;  %v61_v4 = vld [vmem:[#allocation2] sm:$0xf]  ;;  %s757_s0 = smov [#allocation8]   ;;  %s482_s5 = sshll.u32 %s800_s3, 4  ;;  %s483_s5 = int_to_ptr.hbm [resolvable:$true] %s482_s5 }
  0x10   :  { %170 = vmatpush.bf16.msra.mxu1 %v614_v1  ;;  %v612_v5 = vld [vmem:[#allocation5 + $0x38] sm:$0xff]  ;;  %v611_v6 = vld [vmem:[#allocation5 + $0x30] sm:$0xff]  ;;  %v610_v7 = vld [vmem:[#allocation5 + $0x28] sm:$0xff]  ;;  %s480_s2 = sshll.u32 %s757_s0, 4  ;;  %s481_s2 = int_to_ptr.vmem [resolvable:$true] %s480_s2 }
  0x11   :  { %v609_v8 = vld [vmem:[#allocation5 + $0x20] sm:$0xff]  ;;  %v608_v9 = vld [vmem:[#allocation5 + $0x18] sm:$0xff]  ;;  %v607_v10 = vld [vmem:[#allocation5 + $0x10] sm:$0xff] }
  0x12   :  { %v639_v11 = vld [vmem:[#allocation7] ss:$0 sm:$0xff]  ;;  %v616_v17 = vld [vmem:[#allocation5 + $0x58] sm:$0xff]  ;;  %v640_v19 = vld [vmem:[#allocation7 + $0x1] ss:$0 sm:$0xff] }
  0x13   :  { %93 = vmatpush.bf16.msra.mxu0 %v605_v2  ;;  %215 = vmatpush.bf16.msra.mxu2 %v616_v17  ;;  %v615_v18 = vld [vmem:[#allocation5 + $0x50] sm:$0xff]  ;;  %v618_v25 = vld [vmem:[#allocation5 + $0x68] sm:$0xff]  ;;  %v617_v26 = vld [vmem:[#allocation5 + $0x60] sm:$0xff] }
  0x14   :  { %171 = vmatpush.bf16.msra.mxu1 %v613_v3  ;;  %254 = vmatpush.bf16.msra.mxu3 %v618_v25  ;;  %v620_v27 = vld [vmem:[#allocation5 + $0x78] sm:$0xff]  ;;  %v619_v28 = vld [vmem:[#allocation5 + $0x70] sm:$0xff]  ;;  %v622_v37 = vld [vmem:[#allocation5 + $0x88] sm:$0xff] }
  0x15   :  { %v641_v29 = vld [vmem:[#allocation7 + $0x2] ss:$0 sm:$0xff]  ;;  %v624_v35 = vld [vmem:[#allocation5 + $0x98] sm:$0xff]  ;;  %v642_v38 = vld [vmem:[#allocation7 + $0x3] ss:$0 sm:$0xff] }
  0x16   :  { %501 = vmatmul.msk.bf16.vlgmr.msra.gmra.mxu0 %vm82_vm0, %v61_v4  ;;  %v623_v36 = vld [vmem:[#allocation5 + $0x90] sm:$0xff]  ;;  %v621_v44 = vld [vmem:[#allocation5 + $0x80] sm:$0xff]  ;;  %v626_v45 = vld [vmem:[#allocation5 + $0xa8] sm:$0xff] }
  0x17   :  { %216 = vmatpush.bf16.msra.mxu2 %v615_v18  ;;  %293 = vmatpush.bf16.msrb.mxu0 %v620_v27  ;;  %v625_v46 = vld [vmem:[#allocation5 + $0xa0] sm:$0xff]  ;;  %v643_v47 = vld [vmem:[#allocation7 + $0x4] ss:$0 sm:$0xff]  ;;  %v628_v53 = vld [vmem:[#allocation5 + $0xb8] sm:$0xff] }
  0x18   :  { %172 = vmatpush.bf16.msra.mxu1 %v612_v5  ;;  %255 = vmatpush.bf16.msra.mxu3 %v617_v26  ;;  %v627_v54 = vld [vmem:[#allocation5 + $0xb0] sm:$0xff]  ;;  %v630_v61 = vld [vmem:[#allocation5 + $0xc8] sm:$0xff]  ;;  %v629_v62 = vld [vmem:[#allocation5 + $0xc0] sm:$0xff] }
  0x19   :  { %v644_v55 = vld [vmem:[#allocation7 + $0x5] ss:$0 sm:$0xff]  ;;  %v645_v63 = vld [vmem:[#allocation7 + $0x6] ss:$0 sm:$0xff]  ;;  %v646_v5 = vld [vmem:[#allocation7 + $0x7] ss:$0 sm:$0xff] }
  0x1b   :  { %294 = vmatpush.bf16.msrb.mxu0 %v619_v28  ;;  %347 = vmatpush.bf16.msrb.mxu2 %v624_v35 }
  0x1c   :  { %173 = vmatpush.bf16.msra.mxu1 %v611_v6  ;;  %388 = vmatpush.bf16.msrb.mxu3 %v626_v45 }
  0x1f   :  { %348 = vmatpush.bf16.msrb.mxu2 %v623_v36  ;;  %427 = vmatpush.bf16.msra.mxu0 %v628_v53 }
  0x20   :  { %174 = vmatpush.bf16.msra.mxu1 %v610_v7  ;;  %389 = vmatpush.bf16.msrb.mxu3 %v625_v46 }
  0x23   :  { %349 = vmatpush.bf16.msrb.mxu2 %v622_v37  ;;  %428 = vmatpush.bf16.msra.mxu0 %v627_v54 }
  0x24   :  { %175 = vmatpush.bf16.msra.mxu1 %v609_v8 }
  0x27   :  { %350 = vmatpush.bf16.msrb.mxu2 %v621_v44 }
  0x28   :  { %176 = vmatpush.bf16.msra.mxu1 %v608_v9 }
  0x2c   :  { %177 = vmatpush.bf16.msra.mxu1 %v607_v10 }
  0x93   :  { %v95_v12 = vpop.f32.mrf.mxu0 }
  0x94   :  { %v96_v13 = vadd.f32 %v639_v11, %v95_v12  ;;  %v647_v11 = vld [vmem:[#allocation7 + $0x8] ss:$0 sm:$0xff] }
  0x96   :  { %v99_v14 = vmax.f32 %v96_v13, 0.0 }
  0x98   :  { %v118_v15 = vpack.c.bf16 %v99_v14, %v99_v14 }
  0x9a   :  { %178 = vmatmul.bf16.vlgmr.msra.gmra.mxu1 %v118_v15 }
  0x9b   :  { %v97_v16 = vpop.f32.mrf.mxu0 }
 0x117   :  { %v179_v20 = vpop.f32.mrf.mxu1 }
 0x118   :  { %v180_v21 = vadd.f32 %v640_v19, %v179_v20 }
 0x11a   :  { %v183_v22 = vmax.f32 %v180_v21, 0.0 }
 0x11c   :  { %v190_v23 = vpack.c.bf16 %v183_v22, %v183_v22 }
 0x11e   :  { %542 = vmatmul.msk.bf16.vlgmr.msra.gmra.mxu2 %vm82_vm0, %v190_v23 }
 0x11f   :  { %v181_v24 = vpop.f32.mrf.mxu1  ;;  %466 = vmatpush.bf16.msra.mxu2 %v630_v61 }
 0x123   :  { %467 = vmatpush.bf16.msra.mxu2 %v629_v62 }
 0x1a1   :  { %v218_v30 = vpop.f32.mrf.mxu2 }
 0x1a2   :  { %v219_v31 = vadd.f32 %v641_v29, %v218_v30 }
 0x1a4   :  { %v222_v32 = vmax.f32 %v219_v31, 0.0 }
 0x1a6   :  { %v229_v33 = vpack.c.bf16 %v222_v32, %v222_v32 }
 0x1a8   :  { %551 = vmatmul.msk.bf16.vlgmr.msra.gmra.mxu3 %vm82_vm0, %v229_v33 }
 0x1a9   :  { %v220_v34 = vpop.f32.mrf.mxu2 }
 0x22b   :  { %v257_v39 = vpop.f32.mrf.mxu3 }
 0x22c   :  { %v258_v40 = vadd.f32 %v642_v38, %v257_v39 }
 0x22e   :  { %v261_v41 = vmax.f32 %v258_v40, 0.0 }
 0x230   :  { %v268_v42 = vpack.c.bf16 %v261_v41, %v261_v41 }
 0x232   :  { %560 = vmatmul.msk.bf16.vlgmr.msrb.gmra.mxu0 %vm82_vm0, %v268_v42 }
 0x233   :  { %v259_v43 = vpop.f32.mrf.mxu3 }
 0x2af   :  { %v296_v48 = vpop.f32.mrf.mxu0 }
 0x2b0   :  { %v297_v49 = vadd.f32 %v643_v47, %v296_v48 }
 0x2b2   :  { %v300_v50 = vmax.f32 %v297_v49, 0.0 }
 0x2b4   :  { %v311_v51 = vpack.c.bf16 %v300_v50, %v300_v50 }
 0x2b6   :  { %577 = vmatmul.msk.bf16.vlgmr.msrb.gmra.mxu2 %vm339_vm1, %v311_v51 }
 0x2b7   :  { %v298_v52 = vpop.f32.mrf.mxu0 }
 0x339   :  { %v352_v56 = vpop.f32.mrf.mxu2 }
 0x33a   :  { %v353_v57 = vadd.f32 %v644_v55, %v352_v56 }
 0x33c   :  { %v356_v58 = vmax.f32 %v353_v57, 0.0 }
 0x33e   :  { %v363_v59 = vpack.c.bf16 %v356_v58, %v356_v58 }
 0x340   :  { %586 = vmatmul.msk.bf16.vlgmr.msrb.gmra.mxu3 %vm82_vm0, %v363_v59 }
 0x341   :  { %v354_v60 = vpop.f32.mrf.mxu2 }
 0x3c3   :  { %v391_v0 = vpop.f32.mrf.mxu3 }
 0x3c4   :  { %v392_v1 = vadd.f32 %v645_v63, %v391_v0 }
 0x3c6   :  { %v395_v2 = vmax.f32 %v392_v1, 0.0 }
 0x3c8   :  { %v402_v3 = vpack.c.bf16 %v395_v2, %v395_v2 }
 0x3ca   :  { %595 = vmatmul.msk.bf16.vlgmr.msra.gmra.mxu0 %vm82_vm0, %v402_v3 }
 0x3cb   :  { %v393_v4 = vpop.f32.mrf.mxu3 }
 0x447   :  { %v430_v6 = vpop.f32.mrf.mxu0 }
 0x448   :  { %v431_v7 = vadd.f32 %v646_v5, %v430_v6 }
 0x44a   :  { %v434_v8 = vmax.f32 %v431_v7, 0.0 }
 0x44c   :  { %v441_v9 = vpack.c.bf16 %v434_v8, %v434_v8 }
 0x44e   :  { %604 = vmatmul.msk.bf16.vlgmr.msra.gmra.mxu2 %vm82_vm0, %v441_v9 }
 0x44f   :  { %v432_v10 = vpop.f32.mrf.mxu0 }
 0x4d1   :  { %v469_v12 = vpop.f32.mrf.mxu2 }
 0x4d2   :  { %v470_v13 = vadd.f32 %v647_v11, %v469_v12 }
 0x4d4   :  { %v473_v14 = vpack.c.bf16 %v470_v13, %v470_v13 }
 0x4d6   :  { %474 = vst [vmem:[#allocation8] sm:$0xf] %v473_v14 }
 0x4d7   :  { %485 = dma.vmem_to_hbm [thread:$0]  %s481_s2, 64, %s483_s5, [#allocation4]  }
 0x4d9   :  { %v471_v15 = vpop.f32.mrf.mxu2 }
 0x4da   :  { %748 = dma.done.wait [#allocation4], 64  }
 0x4db   :  { %749 = vsyncadd [#allocation4], 4294967232 }
 0x4dc   :  { %490 = vsyncpa [#allocation3], 1 }
 0x4dd   :  { %491 = vsyncpa [#allocation6], 1 }
 0x4de   :  { %492 = vsyncpa [#allocation4], 1 }

</bundles_post_ra>
